<compile_context>
chip_gen: v6e
topology: v6e:2x2x1
jax: 0.10.0
libtpu: 0.0.40
codegen_flags: <defaults>
</compile_context>

<pallas_src>
import functools

import jax
import jax.numpy as jnp
from jax.experimental import pallas as pl
from jax.experimental.pallas import tpu as pltpu

T_REDUCE = 2
THRESHOLD = 1.0
EPS = 0.001


def _batch_dim_semantics():
    """CORE_PARALLEL on v7x-style 2-TC chips, PARALLEL otherwise (safe)."""
    try:
        kind = jax.devices()[0].device_kind.lower()
    except Exception:
        kind = ""
    if "v7" in kind or "tpu7" in kind:
        return pltpu.CORE_PARALLEL
    return pltpu.PARALLEL


def _vmem_limit_bytes():
    """Per-generation scoped-VMEM limit with headroom (56 MiB v7x, 112 MiB v5e/v6e)."""
    cap = 64 * 1024 * 1024
    try:
        cap = int(getattr(pltpu.get_tpu_info(), "vmem_capacity_bytes", cap))
    except Exception:
        pass
    return max(32 * 1024 * 1024, min(112 * 1024 * 1024, cap - 8 * 1024 * 1024))


def _spike_layer_kernel(x_ref, w_ref, b_ref, mask_ref, o_ref, conv_ref, *,
                        T_c, C_in, C_out_p, H, W, KH, KW, theta):
    """One (batch element, spike phase) grid step.

    x_ref    : (1, C_in, T_c*HW + 2*halo) bf16  chunk-averaged input; the T_c
               chunks are laid out contiguously on lanes with a zero halo at
               both ends so every conv tap is one static lane slice.
    w_ref    : (C_out_p, KH*KW*C_in) bf16  im2col-ordered weights (rows padded).
    b_ref    : (C_out_p, 1) f32            bias (padded).
    mask_ref : (KH*KW, T_c*HW) bf16        0/1 validity mask per tap (H/W edges
               and cross-chunk wrap), precomputed in the wrapper.
    o_ref    : (1, 1, C_out_p, T_c*HW) bf16  spikes for this phase.
    conv_ref : (C_out_p, T_c*HW) f32 VMEM scratch; written at phase 0, reused
               by the later phases of the same batch element (P is innermost
               and 'arbitrary' -- required for this reuse to be correct).
    """
    HW = H * W
    L = T_c * HW
    pad_h, pad_w = KH // 2, KW // 2
    halo = pad_h * W + pad_w
    phase = pl.program_id(1)
    inv_theta = 1.0 / theta                       # hoisted reciprocal

    # Soft-reset integrate-and-fire scan over the T_c time steps.
    # TODO(synk): catCuda.getSpikes is an external CUDA kernel; reimplemented
    # here as standard soft-reset IF (u += in; spike = u >= theta; u -= theta).
    def if_scan(make_input):
        u = jnp.zeros((C_out_p, HW), jnp.float32)
        for t in range(T_c):                      # tiny trip count; static
            sl = slice(t * HW, (t + 1) * HW)      # lane slices -> unmasked vst
            u = u + make_input(conv_ref[:, sl])
            ge = u >= theta
            o_ref[0, 0, :, sl] = ge.astype(o_ref.dtype)   # bool -> bf16 spike
            u = jnp.where(ge, u - theta, u)               # soft reset (1 select)

    # ---- conv: ONE fused im2col matmul, only on phase 0 ----------------------
    @pl.when(phase == 0)
    def _():
        rows = []
        for kh in range(KH):
            dy = kh - pad_h
            for kw in range(KW):
                dx = kw - pad_w
                start = halo + dy * W + dx        # static, in [0, 2*halo]
                r = x_ref[0, :, start:start + L]  # (C_in, T_c*HW) lane slice
                if dy != 0 or dx != 0:
                    tap = kh * KW + kw            # kill wrapped/off-edge lanes
                    r = r * mask_ref[tap:tap + 1, :]
                rows.append(r)
        patches = jnp.concatenate(rows, axis=0)   # (KH*KW*C_in, T_c*HW) bf16
        # bias broadcast handled per-vreg by the VPU (no materialized buffer)
        conv_ref[...] = jnp.dot(w_ref[...], patches,
                                preferred_element_type=jnp.float32) + b_ref[...]
        if_scan(lambda c: c)                      # phase 0: mod term == 0

    # ---- phases 1..P-1: input_i = (i*x_out) mod theta + x_out ----------------
    @pl.when(phase != 0)
    def _():
        i_f = phase.astype(jnp.float32)

        def with_mod(c):
            v = i_f * c
            # floor-division form of mod for a positive constant divisor.
            return (v - jnp.floor(v * inv_theta) * theta) + c

        if_scan(with_mod)


def spike_layer_forward(x, weight, bias, T_layer=T_REDUCE, T_nxt=T_REDUCE):
    """x: (N, C_in, H, W, T); weight: (C_out, C_in, KH, KW); bias: (C_out,).

    Returns spikes in the PyTorch layout (N, C_out, H, W, T_nxt * T // T_layer).
    """
    N, C_in, H, W, T = x.shape
    C_out, C_in_w, KH, KW = weight.shape
    assert C_in_w == C_in and T % T_layer == 0
    assert KH % 2 == 1 and KW % 2 == 1            # 'same' conv (padding = k//2)
    T_c = T // T_layer
    P = T_nxt
    HW = H * W
    L = T_c * HW                                   # lane axis inside the kernel
    pad_h, pad_w = KH // 2, KW // 2
    halo = pad_h * W + pad_w
    EXT = L + 2 * halo
    theta = THRESHOLD - EPS
    C_out_p = ((C_out + 15) // 16) * 16            # bf16 sublane-tile alignment

    # Glue (one fused XLA pass under jit): average the T_layer chunks BEFORE
    # the conv (conv is linear, mean-of-conv == conv-of-mean), move to
    # (N, C_in, T_c*HW) with the chunks contiguous on the last axis, add a flat
    # zero halo and cast to bf16.
    xm = x.astype(jnp.float32).reshape(N, C_in, H, W, T_layer, T_c).mean(axis=4)
    xm = jnp.transpose(xm, (0, 1, 4, 2, 3)).reshape(N, C_in, L)
    x_k = jnp.pad(xm, ((0, 0), (0, 0), (halo, halo))).astype(jnp.bfloat16)

    # im2col-ordered weights: column index = (kh*KW + kw)*C_in + ci; rows padded
    # to C_out_p so kernel-side stores/matmul are full sublane tiles.
    w_k = jnp.transpose(weight.astype(jnp.float32), (0, 2, 3, 1))
    w_k = w_k.reshape(C_out, KH * KW * C_in)
    w_k = jnp.pad(w_k, ((0, C_out_p - C_out), (0, 0))).astype(jnp.bfloat16)
    b_k = jnp.pad(bias.astype(jnp.float32), (0, C_out_p - C_out)).reshape(C_out_p, 1)

    # Per-tap 0/1 validity masks over the flat T_c*HW lane axis (H/W edges and
    # cross-chunk wraps), applied multiplicatively in bf16 inside the kernel.
    hh = jnp.tile(jnp.repeat(jnp.arange(H, dtype=jnp.int32), W), T_c)[None, :]
    ww = jnp.tile(jnp.tile(jnp.arange(W, dtype=jnp.int32), H), T_c)[None, :]
    mask_rows = []
    for kh in range(KH):
        dy = kh - pad_h
        for kw in range(KW):
            dx = kw - pad_w
            ok = ((hh + dy >= 0) & (hh + dy < H) &
                  (ww + dx >= 0) & (ww + dx < W))
            mask_rows.append(ok)
    mask_k = jnp.concatenate(mask_rows, axis=0).astype(jnp.bfloat16)  # (K*K, L)

    kernel = functools.partial(
        _spike_layer_kernel, T_c=T_c, C_in=C_in, C_out_p=C_out_p,
        H=H, W=W, KH=KH, KW=KW, theta=theta)

    out = pl.pallas_call(
        kernel,
        out_shape=jax.ShapeDtypeStruct((N, P, C_out_p, L), jnp.bfloat16),
        grid_spec=pltpu.PrefetchScalarGridSpec(
            num_scalar_prefetch=0,
            grid=(N, P),
            in_specs=[
                pl.BlockSpec((1, C_in, EXT), lambda n, p: (n, 0, 0)),
                pl.BlockSpec((C_out_p, KH * KW * C_in), lambda n, p: (0, 0)),
                pl.BlockSpec((C_out_p, 1), lambda n, p: (0, 0)),
                pl.BlockSpec((KH * KW, L), lambda n, p: (0, 0)),
            ],
            out_specs=pl.BlockSpec((1, 1, C_out_p, L),
                                   lambda n, p: (n, p, 0, 0)),
            scratch_shapes=[pltpu.VMEM((C_out_p, L), jnp.float32)],
        ),
        compiler_params=pltpu.CompilerParams(
            # P must stay innermost + 'arbitrary' (conv_ref scratch reuse);
            # the batch axis is core-parallel on v7x, parallel elsewhere.
            dimension_semantics=(_batch_dim_semantics(), pltpu.ARBITRARY),
            vmem_limit_bytes=_vmem_limit_bytes()),
    )(x_k, w_k, b_k, mask_k)

    # Glue: drop C_out padding, back to PyTorch layout (N, C_out, H, W, P*T_c)
    # with time ordered phase-major / chunk-minor, matching torch.cat(dim=-1).
    out = out[:, :, :C_out, :].reshape(N, P, C_out, T_c, H, W)
    out = jnp.transpose(out, (0, 2, 4, 5, 1, 3)).reshape(N, C_out, H, W, P * T_c)
    return out.astype(jnp.float32)


def spike_layer_reference(x, weight, bias, T_layer=T_REDUCE, T_nxt=T_REDUCE):
    """Pure-JAX f32 reference with the module's exact op ordering."""
    N, C_in, H, W, T = x.shape
    C_out = weight.shape[0]
    T_c = T // T_layer
    theta = THRESHOLD - EPS
    outs = []
    for c in jnp.split(x, T_layer, axis=-1):            # (N, C, H, W, T_c)
        c2 = jnp.transpose(c, (0, 4, 1, 2, 3)).reshape(N * T_c, C_in, H, W)
        y = jax.lax.conv_general_dilated(
            c2, weight, (1, 1), 'SAME',
            dimension_numbers=('NCHW', 'OIHW', 'NCHW'),
            precision=jax.lax.Precision.HIGHEST)
        y = y + bias.reshape(1, -1, 1, 1)
        y = y.reshape(N, T_c, C_out, H, W).transpose(0, 2, 3, 4, 1)
        outs.append(y)
    x_out = jnp.mean(jnp.stack(outs), axis=0)            # (N, C_out, H, W, T_c)

    def step(u, z):
        u = u + z
        s = (u >= theta).astype(jnp.float32)
        return u - theta * s, s

    spikes = []
    for i in range(T_nxt):
        inp = jnp.mod(i * x_out, theta) + x_out
        u0 = jnp.zeros(x_out.shape[:-1], jnp.float32)
        _, s = jax.lax.scan(step, u0, jnp.moveaxis(inp, -1, 0))
        spikes.append(jnp.moveaxis(s, 0, -1))
    return jnp.concatenate(spikes, axis=-1)


if __name__ == "__main__":
    key = jax.random.PRNGKey(0)
    kx, kw, kb = jax.random.split(key, 3)

    # small shapes: batch=2, in_channels=4, out_channels=8, spatial=16, time=4
    N, C_in, C_out, H, W, T = 2, 4, 8, 16, 16, 4
    T_layer = T_nxt = T_REDUCE

    x = jax.random.normal(kx, (N, C_in, H, W, T), dtype=jnp.float32)
    weight = 0.2 * jax.random.normal(kw, (C_out, C_in, 3, 3), dtype=jnp.float32)
    bias = 0.1 * jax.random.normal(kb, (C_out,), dtype=jnp.float32)

    fwd = jax.jit(functools.partial(spike_layer_forward,
                                    T_layer=T_layer, T_nxt=T_nxt))
    out = jax.block_until_ready(fwd(x, weight, bias))

    # shape / binary-spike sanity + reference comparison
    T_c = T // T_layer
    assert out.shape == (N, C_out, H, W, T_nxt * T_c), out.shape
    assert bool(jnp.all((out == 0.0) | (out == 1.0)))

    ref = jax.block_until_ready(
        spike_layer_reference(x, weight, bias, T_layer, T_nxt))
    # bf16 MXU operands + mean-before-conv reassociation can flip a handful of
    # borderline spikes vs. the exact-f32 reference; expected disagreement << 1%.
    mismatch_frac = float(jnp.mean(jnp.abs(out - ref)))
    assert mismatch_frac < 3e-2, f"mismatch fraction {mismatch_frac}"

    print("KERNEL_OK")
</pallas_src>

<mosaic_0001>
module attributes {stable_mosaic.version = 11 : i64} {
  func.func @_spike_layer_kernel(%arg0: i32, %arg1: i32, %arg2: memref<1x4x546xbf16, #tpu.memory_space<vmem>>, %arg3: memref<16x36xbf16, #tpu.memory_space<vmem>>, %arg4: memref<16x1xf32, #tpu.memory_space<vmem>>, %arg5: memref<9x512xbf16, #tpu.memory_space<vmem>>, %arg6: memref<1x1x16x512xbf16, #tpu.memory_space<vmem>>, %arg7: memref<16x512xf32, #tpu.memory_space<vmem>>) attributes {dimension_semantics = [#tpu.dimension_semantics<parallel>, #tpu.dimension_semantics<arbitrary>], iteration_bounds = array<i64: 2, 2>, scalar_prefetch = 0 : i64, scratch_operands = 1 : i64, tpu.core_type = #tpu.core_type<tc>, window_params = [{transform_indices = @transform_0, window_bounds = array<i64: 1, 4, 546>}, {pipeline_mode = #tpu.pipeline_mode<synchronous>, transform_indices = @transform_1, window_bounds = array<i64: 16, 36>}, {pipeline_mode = #tpu.pipeline_mode<synchronous>, transform_indices = @transform_2, window_bounds = array<i64: 16, 1>}, {pipeline_mode = #tpu.pipeline_mode<synchronous>, transform_indices = @transform_3, window_bounds = array<i64: 9, 512>}, {transform_indices = @transform_4, window_bounds = array<i64: 1, 1, 16, 512>}]} {
    %c0_i32 = arith.constant 0 : i32
    %0 = arith.cmpi eq, %arg1, %c0_i32 : i32
    %1 = arith.extui %0 : i1 to i32
    %c0_i32_0 = arith.constant 0 : i32
    %2 = arith.cmpi ne, %1, %c0_i32_0 : i32
    scf.if %2 {
      %c0 = arith.constant 0 : index
      %c0_3 = arith.constant 0 : index
      %c0_4 = arith.constant 0 : index
      %6 = vector.load %arg2[%c0, %c0_3, %c0_4] : memref<1x4x546xbf16, #tpu.memory_space<vmem>>, vector<1x4x512xbf16>
      %7 = vector.shape_cast %6 : vector<1x4x512xbf16> to vector<4x512xbf16>
      %c0_5 = arith.constant 0 : index
      %c0_6 = arith.constant 0 : index
      %8 = vector.load %arg5[%c0_5, %c0_6] : memref<9x512xbf16, #tpu.memory_space<vmem>>, vector<1x512xbf16>
      %9 = vector.broadcast %8 : vector<1x512xbf16> to vector<4x512xbf16>
      %10 = arith.mulf %7, %9 : vector<4x512xbf16>
      %c0_7 = arith.constant 0 : index
      %c0_8 = arith.constant 0 : index
      %c1 = arith.constant 1 : index
      %11 = vector.load %arg2[%c0_7, %c0_8, %c1] : memref<1x4x546xbf16, #tpu.memory_space<vmem>>, vector<1x4x512xbf16>
      %12 = vector.shape_cast %11 : vector<1x4x512xbf16> to vector<4x512xbf16>
      %c1_9 = arith.constant 1 : index
      %c0_10 = arith.constant 0 : index
      %13 = vector.load %arg5[%c1_9, %c0_10] : memref<9x512xbf16, #tpu.memory_space<vmem>>, vector<1x512xbf16>
      %14 = vector.broadcast %13 : vector<1x512xbf16> to vector<4x512xbf16>
      %15 = arith.mulf %12, %14 : vector<4x512xbf16>
      %c0_11 = arith.constant 0 : index
      %c0_12 = arith.constant 0 : index
      %c2 = arith.constant 2 : index
      %16 = vector.load %arg2[%c0_11, %c0_12, %c2] : memref<1x4x546xbf16, #tpu.memory_space<vmem>>, vector<1x4x512xbf16>
      %17 = vector.shape_cast %16 : vector<1x4x512xbf16> to vector<4x512xbf16>
      %c2_13 = arith.constant 2 : index
      %c0_14 = arith.constant 0 : index
      %18 = vector.load %arg5[%c2_13, %c0_14] : memref<9x512xbf16, #tpu.memory_space<vmem>>, vector<1x512xbf16>
      %19 = vector.broadcast %18 : vector<1x512xbf16> to vector<4x512xbf16>
      %20 = arith.mulf %17, %19 : vector<4x512xbf16>
      %c0_15 = arith.constant 0 : index
      %c0_16 = arith.constant 0 : index
      %c16 = arith.constant 16 : index
      %21 = vector.load %arg2[%c0_15, %c0_16, %c16] : memref<1x4x546xbf16, #tpu.memory_space<vmem>>, vector<1x4x512xbf16>
      %22 = vector.shape_cast %21 : vector<1x4x512xbf16> to vector<4x512xbf16>
      %c3 = arith.constant 3 : index
      %c0_17 = arith.constant 0 : index
      %23 = vector.load %arg5[%c3, %c0_17] : memref<9x512xbf16, #tpu.memory_space<vmem>>, vector<1x512xbf16>
      %24 = vector.broadcast %23 : vector<1x512xbf16> to vector<4x512xbf16>
      %25 = arith.mulf %22, %24 : vector<4x512xbf16>
      %c0_18 = arith.constant 0 : index
      %c0_19 = arith.constant 0 : index
      %c17 = arith.constant 17 : index
      %26 = vector.load %arg2[%c0_18, %c0_19, %c17] : memref<1x4x546xbf16, #tpu.memory_space<vmem>>, vector<1x4x512xbf16>
      %27 = vector.shape_cast %26 : vector<1x4x512xbf16> to vector<4x512xbf16>
      %c0_20 = arith.constant 0 : index
      %c0_21 = arith.constant 0 : index
      %c18 = arith.constant 18 : index
      %28 = vector.load %arg2[%c0_20, %c0_21, %c18] : memref<1x4x546xbf16, #tpu.memory_space<vmem>>, vector<1x4x512xbf16>
      %29 = vector.shape_cast %28 : vector<1x4x512xbf16> to vector<4x512xbf16>
      %c5 = arith.constant 5 : index
      %c0_22 = arith.constant 0 : index
      %30 = vector.load %arg5[%c5, %c0_22] : memref<9x512xbf16, #tpu.memory_space<vmem>>, vector<1x512xbf16>
      %31 = vector.broadcast %30 : vector<1x512xbf16> to vector<4x512xbf16>
      %32 = arith.mulf %29, %31 : vector<4x512xbf16>
      %c0_23 = arith.constant 0 : index
      %c0_24 = arith.constant 0 : index
      %c32 = arith.constant 32 : index
      %33 = vector.load %arg2[%c0_23, %c0_24, %c32] : memref<1x4x546xbf16, #tpu.memory_space<vmem>>, vector<1x4x512xbf16>
      %34 = vector.shape_cast %33 : vector<1x4x512xbf16> to vector<4x512xbf16>
      %c6 = arith.constant 6 : index
      %c0_25 = arith.constant 0 : index
      %35 = vector.load %arg5[%c6, %c0_25] : memref<9x512xbf16, #tpu.memory_space<vmem>>, vector<1x512xbf16>
      %36 = vector.broadcast %35 : vector<1x512xbf16> to vector<4x512xbf16>
      %37 = arith.mulf %34, %36 : vector<4x512xbf16>
      %c0_26 = arith.constant 0 : index
      %c0_27 = arith.constant 0 : index
      %c33 = arith.constant 33 : index
      %38 = vector.load %arg2[%c0_26, %c0_27, %c33] : memref<1x4x546xbf16, #tpu.memory_space<vmem>>, vector<1x4x512xbf16>
      %39 = vector.shape_cast %38 : vector<1x4x512xbf16> to vector<4x512xbf16>
      %c7 = arith.constant 7 : index
      %c0_28 = arith.constant 0 : index
      %40 = vector.load %arg5[%c7, %c0_28] : memref<9x512xbf16, #tpu.memory_space<vmem>>, vector<1x512xbf16>
      %41 = vector.broadcast %40 : vector<1x512xbf16> to vector<4x512xbf16>
      %42 = arith.mulf %39, %41 : vector<4x512xbf16>
      %c0_29 = arith.constant 0 : index
      %c0_30 = arith.constant 0 : index
      %c34 = arith.constant 34 : index
      %43 = vector.load %arg2[%c0_29, %c0_30, %c34] : memref<1x4x546xbf16, #tpu.memory_space<vmem>>, vector<1x4x512xbf16>
      %44 = vector.shape_cast %43 : vector<1x4x512xbf16> to vector<4x512xbf16>
      %c8 = arith.constant 8 : index
      %c0_31 = arith.constant 0 : index
      %45 = vector.load %arg5[%c8, %c0_31] : memref<9x512xbf16, #tpu.memory_space<vmem>>, vector<1x512xbf16>
      %46 = vector.broadcast %45 : vector<1x512xbf16> to vector<4x512xbf16>
      %47 = arith.mulf %44, %46 : vector<4x512xbf16>
      %48 = tpu.concatenate %10, %15, %20, %25, %27, %32, %37, %42, %47 in 0 : vector<4x512xbf16>, vector<4x512xbf16>, vector<4x512xbf16>, vector<4x512xbf16>, vector<4x512xbf16>, vector<4x512xbf16>, vector<4x512xbf16>, vector<4x512xbf16>, vector<4x512xbf16> -> vector<36x512xbf16>
      %c0_32 = arith.constant 0 : index
      %c0_33 = arith.constant 0 : index
      %49 = vector.load %arg3[%c0_32, %c0_33] : memref<16x36xbf16, #tpu.memory_space<vmem>>, vector<16x36xbf16>
      %cst = arith.constant dense<0.000000e+00> : vector<16x512xf32>
      %50 = tpu.matmul %49, %48, %cst {dimension_numbers = #tpu.dot_dimension_numbers<[1], [0], [0], [1], [0, 0, 1, 1], [], []>} : vector<16x36xbf16>, vector<36x512xbf16>, vector<16x512xf32> -> vector<16x512xf32>
      %c0_34 = arith.constant 0 : index
      %c0_35 = arith.constant 0 : index
      %51 = vector.load %arg4[%c0_34, %c0_35] : memref<16x1xf32, #tpu.memory_space<vmem>>, vector<16x1xf32>
      %52 = vector.broadcast %51 : vector<16x1xf32> to vector<16x512xf32>
      %53 = arith.addf %50, %52 : vector<16x512xf32>
      %c0_36 = arith.constant 0 : index
      %c0_37 = arith.constant 0 : index
      %54 = vector.load %arg7[%c0_36, %c0_37] : memref<16x512xf32, #tpu.memory_space<vmem>>, vector<16x512xf32>
      tpu.vector_store %arg7[%c0_36, %c0_37], %53 {strides = array<i32>} : memref<16x512xf32, #tpu.memory_space<vmem>>, vector<16x512xf32>,
      %cst_38 = arith.constant 0.000000e+00 : f32
      %55 = vector.broadcast %cst_38 : f32 to vector<16x256xf32>
      %c0_39 = arith.constant 0 : index
      %c0_40 = arith.constant 0 : index
      %56 = vector.load %arg7[%c0_39, %c0_40] : memref<16x512xf32, #tpu.memory_space<vmem>>, vector<16x256xf32>
      %57 = arith.addf %55, %56 : vector<16x256xf32>
      %cst_41 = arith.constant 9.990000e-01 : f32
      %58 = vector.broadcast %cst_41 : f32 to vector<16x256xf32>
      %59 = arith.cmpf oge, %57, %58 : vector<16x256xf32>
      %60 = arith.extui %59 : vector<16x256xi1> to vector<16x256xi32>
      %61 = arith.sitofp %60 : vector<16x256xi32> to vector<16x256xf32>
      %62 = arith.truncf %61 : vector<16x256xf32> to vector<16x256xbf16>
      %c0_42 = arith.constant 0 : index
      %c0_43 = arith.constant 0 : index
      %c0_44 = arith.constant 0 : index
      %c0_45 = arith.constant 0 : index
      %63 = vector.load %arg6[%c0_42, %c0_43, %c0_44, %c0_45] : memref<1x1x16x512xbf16, #tpu.memory_space<vmem>>, vector<1x1x16x256xbf16>
      %64 = vector.shape_cast %63 : vector<1x1x16x256xbf16> to vector<16x256xbf16>
      %65 = vector.shape_cast %62 : vector<16x256xbf16> to vector<1x1x16x256xbf16>
      tpu.vector_store %arg6[%c0_42, %c0_43, %c0_44, %c0_45], %65 {strides = array<i32>} : memref<1x1x16x512xbf16, #tpu.memory_space<vmem>>, vector<1x1x16x256xbf16>,
      %cst_46 = arith.constant 9.990000e-01 : f32
      %66 = vector.broadcast %cst_46 : f32 to vector<16x256xf32>
      %67 = arith.subf %57, %66 : vector<16x256xf32>
      %68 = arith.select %59, %67, %57 : vector<16x256xi1>, vector<16x256xf32>
      %c0_47 = arith.constant 0 : index
      %c256 = arith.constant 256 : index
      %69 = vector.load %arg7[%c0_47, %c256] : memref<16x512xf32, #tpu.memory_space<vmem>>, vector<16x256xf32>
      %70 = arith.addf %68, %69 : vector<16x256xf32>
      %cst_48 = arith.constant 9.990000e-01 : f32
      %71 = vector.broadcast %cst_48 : f32 to vector<16x256xf32>
      %72 = arith.cmpf oge, %70, %71 : vector<16x256xf32>
      %73 = arith.extui %72 : vector<16x256xi1> to vector<16x256xi32>
      %74 = arith.sitofp %73 : vector<16x256xi32> to vector<16x256xf32>
      %75 = arith.truncf %74 : vector<16x256xf32> to vector<16x256xbf16>
      %c0_49 = arith.constant 0 : index
      %c0_50 = arith.constant 0 : index
      %c0_51 = arith.constant 0 : index
      %c256_52 = arith.constant 256 : index
      %76 = vector.load %arg6[%c0_49, %c0_50, %c0_51, %c256_52] : memref<1x1x16x512xbf16, #tpu.memory_space<vmem>>, vector<1x1x16x256xbf16>
      %77 = vector.shape_cast %76 : vector<1x1x16x256xbf16> to vector<16x256xbf16>
      %78 = vector.shape_cast %75 : vector<16x256xbf16> to vector<1x1x16x256xbf16>
      tpu.vector_store %arg6[%c0_49, %c0_50, %c0_51, %c256_52], %78 {strides = array<i32>} : memref<1x1x16x512xbf16, #tpu.memory_space<vmem>>, vector<1x1x16x256xbf16>,
    } else {
    }
    %c0_i32_1 = arith.constant 0 : i32
    %3 = arith.cmpi ne, %arg1, %c0_i32_1 : i32
    %4 = arith.extui %3 : i1 to i32
    %c0_i32_2 = arith.constant 0 : i32
    %5 = arith.cmpi ne, %4, %c0_i32_2 : i32
    scf.if %5 {
      %6 = arith.sitofp %arg1 : i32 to f32
      %cst = arith.constant 0.000000e+00 : f32
      %7 = vector.broadcast %cst : f32 to vector<16x256xf32>
      %c0 = arith.constant 0 : index
      %c0_3 = arith.constant 0 : index
      %8 = vector.load %arg7[%c0, %c0_3] : memref<16x512xf32, #tpu.memory_space<vmem>>, vector<16x256xf32>
      %9 = vector.broadcast %6 : f32 to vector<16x256xf32>
      %10 = arith.mulf %9, %8 : vector<16x256xf32>
      %cst_4 = arith.constant 1.001001 : f32
      %11 = vector.broadcast %cst_4 : f32 to vector<16x256xf32>
      %12 = arith.mulf %10, %11 : vector<16x256xf32>
      %13 = math.floor %12 : vector<16x256xf32>
      %cst_5 = arith.constant 9.990000e-01 : f32
      %14 = vector.broadcast %cst_5 : f32 to vector<16x256xf32>
      %15 = arith.mulf %13, %14 : vector<16x256xf32>
      %16 = arith.subf %10, %15 : vector<16x256xf32>
      %17 = arith.addf %16, %8 : vector<16x256xf32>
      %18 = arith.addf %7, %17 : vector<16x256xf32>
      %cst_6 = arith.constant 9.990000e-01 : f32
      %19 = vector.broadcast %cst_6 : f32 to vector<16x256xf32>
      %20 = arith.cmpf oge, %18, %19 : vector<16x256xf32>
      %21 = arith.extui %20 : vector<16x256xi1> to vector<16x256xi32>
      %22 = arith.sitofp %21 : vector<16x256xi32> to vector<16x256xf32>
      %23 = arith.truncf %22 : vector<16x256xf32> to vector<16x256xbf16>
      %c0_7 = arith.constant 0 : index
      %c0_8 = arith.constant 0 : index
      %c0_9 = arith.constant 0 : index
      %c0_10 = arith.constant 0 : index
      %24 = vector.load %arg6[%c0_7, %c0_8, %c0_9, %c0_10] : memref<1x1x16x512xbf16, #tpu.memory_space<vmem>>, vector<1x1x16x256xbf16>
      %25 = vector.shape_cast %24 : vector<1x1x16x256xbf16> to vector<16x256xbf16>
      %26 = vector.shape_cast %23 : vector<16x256xbf16> to vector<1x1x16x256xbf16>
      tpu.vector_store %arg6[%c0_7, %c0_8, %c0_9, %c0_10], %26 {strides = array<i32>} : memref<1x1x16x512xbf16, #tpu.memory_space<vmem>>, vector<1x1x16x256xbf16>,
      %cst_11 = arith.constant 9.990000e-01 : f32
      %27 = vector.broadcast %cst_11 : f32 to vector<16x256xf32>
      %28 = arith.subf %18, %27 : vector<16x256xf32>
      %29 = arith.select %20, %28, %18 : vector<16x256xi1>, vector<16x256xf32>
      %c0_12 = arith.constant 0 : index
      %c256 = arith.constant 256 : index
      %30 = vector.load %arg7[%c0_12, %c256] : memref<16x512xf32, #tpu.memory_space<vmem>>, vector<16x256xf32>
      %31 = vector.broadcast %6 : f32 to vector<16x256xf32>
      %32 = arith.mulf %31, %30 : vector<16x256xf32>
      %cst_13 = arith.constant 1.001001 : f32
      %33 = vector.broadcast %cst_13 : f32 to vector<16x256xf32>
      %34 = arith.mulf %32, %33 : vector<16x256xf32>
      %35 = math.floor %34 : vector<16x256xf32>
      %cst_14 = arith.constant 9.990000e-01 : f32
      %36 = vector.broadcast %cst_14 : f32 to vector<16x256xf32>
      %37 = arith.mulf %35, %36 : vector<16x256xf32>
      %38 = arith.subf %32, %37 : vector<16x256xf32>
      %39 = arith.addf %38, %30 : vector<16x256xf32>
      %40 = arith.addf %29, %39 : vector<16x256xf32>
      %cst_15 = arith.constant 9.990000e-01 : f32
      %41 = vector.broadcast %cst_15 : f32 to vector<16x256xf32>
      %42 = arith.cmpf oge, %40, %41 : vector<16x256xf32>
      %43 = arith.extui %42 : vector<16x256xi1> to vector<16x256xi32>
      %44 = arith.sitofp %43 : vector<16x256xi32> to vector<16x256xf32>
      %45 = arith.truncf %44 : vector<16x256xf32> to vector<16x256xbf16>
      %c0_16 = arith.constant 0 : index
      %c0_17 = arith.constant 0 : index
      %c0_18 = arith.constant 0 : index
      %c256_19 = arith.constant 256 : index
      %46 = vector.load %arg6[%c0_16, %c0_17, %c0_18, %c256_19] : memref<1x1x16x512xbf16, #tpu.memory_space<vmem>>, vector<1x1x16x256xbf16>
      %47 = vector.shape_cast %46 : vector<1x1x16x256xbf16> to vector<16x256xbf16>
      %48 = vector.shape_cast %45 : vector<16x256xbf16> to vector<1x1x16x256xbf16>
      tpu.vector_store %arg6[%c0_16, %c0_17, %c0_18, %c256_19], %48 {strides = array<i32>} : memref<1x1x16x512xbf16, #tpu.memory_space<vmem>>, vector<1x1x16x256xbf16>,
    } else {
    }
    return
  }
  func.func @transform_0(%arg0: i32, %arg1: i32) -> (i32, i32, i32) {
    %c0_i32 = arith.constant 0 : i32
    %c0_i32_0 = arith.constant 0 : i32
    %c0_i32_1 = arith.constant 0 : i32
    return %arg0, %c0_i32, %c0_i32_0 : i32, i32, i32
  }
  func.func @transform_1(%arg0: i32, %arg1: i32) -> (i32, i32) {
    %c0_i32 = arith.constant 0 : i32
    %c0_i32_0 = arith.constant 0 : i32
    %c0_i32_1 = arith.constant 0 : i32
    return %c0_i32, %c0_i32_0 : i32, i32
  }
  func.func @transform_2(%arg0: i32, %arg1: i32) -> (i32, i32) {
    %c0_i32 = arith.constant 0 : i32
    %c0_i32_0 = arith.constant 0 : i32
    %c0_i32_1 = arith.constant 0 : i32
    return %c0_i32, %c0_i32_0 : i32, i32
  }
  func.func @transform_3(%arg0: i32, %arg1: i32) -> (i32, i32) {
    %c0_i32 = arith.constant 0 : i32
    %c0_i32_0 = arith.constant 0 : i32
    %c0_i32_1 = arith.constant 0 : i32
    return %c0_i32, %c0_i32_0 : i32, i32
  }
  func.func @transform_4(%arg0: i32, %arg1: i32) -> (i32, i32, i32, i32) {
    %c0_i32 = arith.constant 0 : i32
    %c0_i32_0 = arith.constant 0 : i32
    %c0_i32_1 = arith.constant 0 : i32
    return %arg0, %arg1, %c0_i32, %c0_i32_0 : i32, i32, i32, i32
  }
}

</mosaic_0001>

<bundles_post_ra>
// kernel: spike_layer_forward.1
= control target key start
LH: loop header
LB: loop body
LE: loop exit
PB: predicated region body
PF: predicated region fallthrough
CT: control target
= control target key end

     0   :  { %s1836_s15 = smov 0   ;;  %s1838_s16 = smov 0   ;;  %s2321_s0 = inlined_call_operand.vmem [shape: bf16[2,4,546], index: 0, kind: input, shape index: {}]   ;;  %s2322_s1 = inlined_call_operand.vmem [shape: bf16[16,36], index: 1, kind: input, shape index: {}]   ;;  %s2323_s2 = inlined_call_operand.vmem [shape: f32[16,1], index: 2, kind: input, shape index: {}]   ;;  %s2324_s3 = inlined_call_operand.vmem [shape: bf16[9,512], index: 3, kind: input, shape index: {}]   ;;  %s2325_s4 = inlined_call_operand.vmem [shape: bf16[2,2,16,512], index: 4, kind: output, shape index: {}]  }
   0x1   :  { %s1840_s17 = smov 0   ;;  %s1842_s18 = smov 0  }
   0x2   :  { %s1844_s19 = smov 0  }
   0x3 LB: > { %s23_s20 = sadd.s32 1, %s1782_s17  ;;  %s26_s21 = sadd.s32 1, %s1786_s18  ;;  %s1790_s19 = sphi %s1844_s19, %s14_s19   ;;  %s1786_s18 = sphi %s1842_s18, %s2329_s18   ;;  %s1782_s17 = sphi %s1840_s17, %s2328_s17   ;;  %s1778_s16 = sphi %s1838_s16, %s2327_s16   ;;  %s1774_s15 = sphi %s1836_s15, %s2326_s15  }
   0x4   : > { %p24_p0 = scmp.ge.s32.totalorder %s23_s20, 2  ;;  %p1594_p1 = scmp.ge.s32.totalorder %s1790_s19, 1 }
   0x5   : > { %p176_p2 = scmp.lt.s32.totalorder %s1790_s19, 5 }
   0x6   : > { %s2331_s20 = smov (%p24_p0, %s23_s20), 0  ;;  %s2333_s21 = smov (!%p24_p0, %s26_s21), %s1786_s18 }
   0x7   : > { %p177_p3 = pnand %p1594_p1, %p176_p2  ;;  %p28_p4 = scmp.ge.s32.totalorder %s2333_s21, 2 }
   0x8   : > { %p206_p5 = scmp.lt.s32.totalorder (!%p177_p3), %s1778_s16, 1  ;;  %p213_p6 = scmp.lt.s32.totalorder (!%p177_p3), %s1774_s15, 1 }
   0x9   : > { %s2335_s21 = smov (%p28_p4, %s2333_s21), 0  ;;  %180 = sbr.rel (%p177_p3) target bundleno = 598 (0x256), region = 36 }
   0xa   : > { %p1599_p7 = scmp.ne.s32.totalorder (!%p177_p3), %s1774_s15, 0 }
   0xe   : > { %s2337_s16 = smov (!%p206_p5, %s1778_s16), 1  ;;  %s1793_s5 = smov (!%p1599_p7), 34  }
   0xf   : > { %s214_s22 = scalar_select %p213_p6, %s1774_s15, 1 }
  0x10   : > { %s1668_s23 = smul.u32 10, %s2337_s16  ;;  %s1597_s24 = sshll.u32 %s2337_s16, 4 }
  0x11   : > { %s1596_s25 = sshll.u32 %s214_s22, 3  ;;  %224 = sbr.rel (%p1599_p7) target bundleno = 564 (0x234), region = 40 }
  0x12   : > { %s1873_s28 = scalar_lea.vmem %s2321_s0, %s1668_s23  ;;  %s217_s29 = sadd.s32 %s1597_s24, %s1596_s25 }
  0x13   : > { %s1598_s30 = sshll.u32 %s217_s29, 2  ;;  %s1794_s11 = smov (!%p1599_p7), 32  }
  0x14   : > { %s1878_s7 = scalar_lea.vmem %s2325_s4, %s1598_s30  ;;  %s1795_s12 = smov (!%p1599_p7), 2  }
  0x15   : > { %s1796_s13 = smov (!%p1599_p7), 18   ;;  %s1797_s14 = smov (!%p1599_p7), 1  }
  0x16   : > { %v241_v0 = vlaneseq  ;;  %v678_v1 = vld [vmem:[%s2324_s3 + $0x10] sm:$0x11]  ;;  %v679_v2 = vld [vmem:[%s2324_s3 + $0x18] sm:$0x11]  ;;  %v1792_v3 = vmov 1983009808  }
  0x17   : > { %v273_v4 = vunpack.c.l.s4 %v1792_v3  ;;  %v1616_v5 = vcombine.low %v678_v1, %v678_v1  ;;  %v1617_v6 = vcombine.high %v678_v1, %v678_v1  ;;  %v1618_v7 = vcombine.low %v679_v2, %v679_v2  ;;  %v550_v8 = vld [vmem:[%s2324_s3] sm:$0x88]  ;;  %v551_v9 = vld [vmem:[%s2324_s3 + $0x8] sm:$0x88]  ;;  %v348_v26 = vld [vmem:[%s2324_s3] sm:$0x22] }
  0x18   : > { %v242_v10 = vshrl.u32 %v241_v0, 7  ;;  %v1619_v11 = vcombine.high %v679_v2, %v679_v2  ;;  %v1893_v12 = vcombine.low %v550_v8, %v550_v8  ;;  %v1895_v13 = vcombine.high %v550_v8, %v550_v8  ;;  %v349_v31 = vld [vmem:[%s2324_s3 + $0x8] sm:$0x22]  ;;  %v476_v44 = vld [vmem:[%s2324_s3] sm:$0x44]  ;;  %s1798_s16 = smov 33  }
  0x19   : > { %v274_v14 = vunpack.c.0.s8 %v273_v4  ;;  %v691_v15 = vpack.i.b16 %v1616_v5, %v1616_v5  ;;  %v698_v16 = vpack.i.b16 %v1617_v6, %v1617_v6  ;;  %v705_v17 = vpack.i.b16 %v1618_v7, %v1618_v7  ;;  %v477_v53 = vld [vmem:[%s2324_s3 + $0x8] sm:$0x44]  ;;  %v226_v2 = vld [vmem:[%s2324_s3] sm:$0x11]  ;;  %s1799_s22 = smov 16   ;;  %s1800_s23 = smov 111  }
  0x1a   : > { %v1897_v18 = vsub.s32 0, %v242_v10  ;;  %v712_v19 = vpack.i.b16 %v1619_v11, %v1619_v11  ;;  %v1899_v20 = vcombine.low %v551_v9, %v551_v9  ;;  %v1901_v21 = vcombine.high %v551_v9, %v551_v9  ;;  %s1802_s24 = smov 96   ;;  %s1803_s25 = smov 126  }
  0x1b   : > { %v1903_v22 = vsub.s32 %v274_v14, %v242_v10  ;;  %v563_v23 = vpack.i.b16 %v1893_v12, %v1893_v12  ;;  %v1907_v24 = vsub.s32 3, %v242_v10  ;;  %v570_v25 = vpack.i.b16 %v1895_v13, %v1895_v13  ;;  %v227_v14 = vld [vmem:[%s2324_s3 + $0x8] sm:$0x11]  ;;  %s1804_s26 = smov 110   ;;  %s1805_s27 = smov 127  }
  0x1c   : > { %v696_v27 = vrot.slane %v691_v15, %v1897_v18  ;;  %v703_v28 = vrot.slane %v698_v16, %v1897_v18  ;;  %v710_v29 = vrot.slane %v705_v17, %v1897_v18  ;;  %v717_v30 = vrot.slane %v712_v19, %v1897_v18  ;;  %s1806_s29 = smov 95   ;;  %s1807_s30 = smov 112  }
  0x1d   : > { %v568_v32 = vrot.slane %v563_v23, %v1907_v24  ;;  %v575_v33 = vrot.slane %v570_v25, %v1907_v24  ;;  %v577_v34 = vpack.i.b16 %v1899_v20, %v1899_v20  ;;  %v584_v35 = vpack.i.b16 %v1901_v21, %v1901_v21 }
  0x1e   : > { %v722_v36 = vcombine.low %v696_v27, %v703_v28  ;;  %v723_v37 = vcombine.low %v710_v29, %v717_v30  ;;  %v1927_v38 = vcombine.low %v348_v26, %v348_v26  ;;  %v1929_v39 = vcombine.high %v348_v26, %v348_v26 }
  0x1f   : > { %v582_v40 = vrot.slane %v577_v34, %v1907_v24  ;;  %v589_v41 = vrot.slane %v584_v35, %v1907_v24  ;;  %v594_v42 = vcombine.low %v568_v32, %v575_v33  ;;  %v1933_v43 = vcombine.low %v349_v31, %v349_v31 }
  0x20   : > { %v730_v45 = vrot.slane %v722_v36, %v1903_v22  ;;  %v737_v46 = vrot.slane %v723_v37, %v1903_v22  ;;  %v1940_v47 = vcombine.high %v349_v31, %v349_v31  ;;  %v361_v48 = vpack.i.b16 %v1927_v38, %v1927_v38 }
  0x21   : > { %v595_v49 = vcombine.low %v582_v40, %v589_v41  ;;  %v602_v50 = vrot.slane %v594_v42, %v1903_v22  ;;  %v1945_v51 = vsub.s32 1, %v242_v10  ;;  %v368_v52 = vpack.i.b16 %v1929_v39, %v1929_v39 }
  0x22   : > { %v738_v54 = vcombine.low %v730_v45, %v737_v46  ;;  %v375_v55 = vpack.i.b16 %v1933_v43, %v1933_v43  ;;  %v382_v56 = vpack.i.b16 %v1940_v47, %v1940_v47  ;;  %v1608_v57 = vcombine.low %v476_v44, %v476_v44 }
  0x23   : > { %v609_v58 = vrot.slane %v595_v49, %v1903_v22  ;;  %v366_v59 = vrot.slane %v361_v48, %v1945_v51  ;;  %v373_v60 = vrot.slane %v368_v52, %v1945_v51  ;;  %v1609_v61 = vcombine.high %v476_v44, %v476_v44 }
  0x24   : > { %739 = vrot.lane.b32.xlu1 %v738_v54, %s1793_s5  ;;  %v380_v62 = vrot.slane %v375_v55, %v1945_v51  ;;  %v387_v63 = vrot.slane %v382_v56, %v1945_v51  ;;  %v1610_v0 = vcombine.low %v477_v53, %v477_v53  ;;  %v1611_v1 = vcombine.high %v477_v53, %v477_v53 }
  0x25   : > { %v610_v3 = vcombine.low %v602_v50, %v609_v58  ;;  %v392_v4 = vcombine.low %v366_v59, %v373_v60  ;;  %v489_v5 = vshrl.u32 %v1608_v57, 16  ;;  %v494_v6 = vsub.s32 2, %v242_v10 }
  0x26   : > { %v393_v7 = vcombine.low %v380_v62, %v387_v63  ;;  %v497_v8 = vshrl.u32 %v1609_v61, 16  ;;  %v505_v9 = vshrl.u32 %v1610_v0, 16  ;;  %v513_v11 = vshrl.u32 %v1611_v1, 16 }
  0x27   : > { %611 = vrot.lane.b32.xlu0 %v610_v3, %s1794_s11  ;;  %v400_v15 = vrot.slane %v392_v4, %v1903_v22  ;;  %v490_v16 = vpack.i.b16 %v489_v5, %v489_v5  ;;  %v1600_v17 = vcombine.low %v226_v2, %v226_v2  ;;  %v1601_v19 = vcombine.high %v226_v2, %v226_v2 }
  0x28   : > { %v407_v23 = vrot.slane %v393_v7, %v1903_v22  ;;  %v498_v25 = vpack.i.b16 %v497_v8, %v497_v8  ;;  %v506_v26 = vpack.i.b16 %v505_v9, %v505_v9  ;;  %v514_v10 = vpack.i.b16 %v513_v11, %v513_v11 }
  0x29   : > { %v495_v27 = vrot.slane %v490_v16, %v494_v6  ;;  %v1602_v28 = vcombine.low %v227_v14, %v227_v14  ;;  %v1603_v29 = vcombine.high %v227_v14, %v227_v14  ;;  %v246_v30 = vpack.i.b16 %v1601_v19, %v1601_v19 }
  0x2a   : > { %v408_v31 = vcombine.low %v400_v15, %v407_v23  ;;  %v503_v32 = vrot.slane %v498_v25, %v494_v6  ;;  %v511_v33 = vrot.slane %v506_v26, %v494_v6  ;;  %v519_v34 = vrot.slane %v514_v10, %v494_v6 }
  0x2b   : > { %v1970_v35 = vrot.slane %v246_v30, %v1897_v18  ;;  %v253_v36 = vpack.i.b16 %v1602_v28, %v1602_v28  ;;  %v260_v37 = vpack.i.b16 %v1603_v29, %v1603_v29  ;;  %v290_v40 = vshrl.u32 %v1600_v17, 16 }
  0x2c   : > { %409 = vrot.lane.b32.xlu1 %v408_v31, %s1795_s12  ;;  %v524_v41 = vcombine.low %v495_v27, %v503_v32  ;;  %v525_v42 = vcombine.low %v511_v33, %v519_v34  ;;  %v297_v44 = vshrl.u32 %v1601_v19, 16  ;;  %v304_v45 = vshrl.u32 %v1602_v28, 16  ;;  %v2004_v27 = vld [vmem:[%s1873_s28] sm:$0xff] }
  0x2d   : > { %v1973_v46 = vrot.slane %v253_v36, %v1897_v18  ;;  %v1976_v48 = vrot.slane %v260_v37, %v1897_v18  ;;  %v291_v49 = vpack.i.b16 %v290_v40, %v290_v40  ;;  %v311_v50 = vshrl.u32 %v1603_v29, 16 }
  0x2e   : > { %v532_v52 = vrot.slane %v524_v41, %v1903_v22  ;;  %v539_v53 = vrot.slane %v525_v42, %v1903_v22  ;;  %v298_v54 = vpack.i.b16 %v297_v44, %v297_v44  ;;  %v305_v55 = vpack.i.b16 %v304_v45, %v304_v45  ;;  %v2018_v45 = vld [vmem:[%s1873_s28 + $0x8] sm:$0x3]  ;;  %s1801_s28 = smov 94  }
  0x2f   : > { %v296_v56 = vrot.slane %v291_v49, %v1897_v18  ;;  %v312_v57 = vpack.i.b16 %v311_v50, %v311_v50  ;;  %v239_v58 = vpack.i.b16 %v1600_v17, %v1600_v17  ;;  %v620_v59 = vshrl.u32 %v1893_v12, 16 }
  0x30   : > { %v540_v60 = vcombine.low %v532_v52, %v539_v53  ;;  %v303_v61 = vrot.slane %v298_v54, %v1897_v18  ;;  %v310_v62 = vrot.slane %v305_v55, %v1897_v18  ;;  %v627_v63 = vshrl.u32 %v1895_v13, 16 }
  0x31   : > { %v317_v0 = vrot.slane %v312_v57, %v1897_v18  ;;  %v1987_v1 = vrot.slane %v239_v58, %v1897_v18  ;;  %v621_v2 = vpack.i.b16 %v620_v59, %v620_v59  ;;  %v634_v3 = vshrl.u32 %v1899_v20, 16 }
  0x32   : > { %541 = vrot.lane.b32.xlu0 %v540_v60, %s1796_s13  ;;  %v322_v4 = vcombine.low %v296_v56, %v303_v61  ;;  %v628_v5 = vpack.i.b16 %v627_v63, %v627_v63  ;;  %v641_v12 = vshrl.u32 %v1901_v21, 16  ;;  %v418_v6 = vshrl.u32 %v1927_v38, 16 }
  0x33   : > { %v323_v7 = vcombine.low %v310_v62, %v317_v0  ;;  %v626_v8 = vrot.slane %v621_v2, %v1907_v24  ;;  %v635_v13 = vpack.i.b16 %v634_v3, %v634_v3  ;;  %v425_v9 = vshrl.u32 %v1929_v39, 16 }
  0x34   : > { %v330_v18 = vrot.slane %v322_v4, %v1903_v22  ;;  %v633_v11 = vrot.slane %v628_v5, %v1907_v24  ;;  %v642_v20 = vpack.i.b16 %v641_v12, %v641_v12  ;;  %v419_v14 = vpack.i.b16 %v418_v6, %v418_v6 }
  0x35   : > { %v337_v15 = vrot.slane %v323_v7, %v1903_v22  ;;  %v640_v16 = vrot.slane %v635_v13, %v1907_v24  ;;  %v426_v21 = vpack.i.b16 %v425_v9, %v425_v9  ;;  %v432_v38 = vshrl.u32 %v1933_v43, 16 }
  0x36   : > { %v647_v17 = vrot.slane %v642_v20, %v1907_v24  ;;  %v652_v19 = vcombine.low %v626_v8, %v633_v11  ;;  %v424_v23 = vrot.slane %v419_v14, %v1945_v51  ;;  %v439_v39 = vshrl.u32 %v1940_v47, 16 }
  0x37   : > { %v338_v25 = vcombine.low %v330_v18, %v337_v15  ;;  %v431_v26 = vrot.slane %v426_v21, %v1945_v51  ;;  %v433_v10 = vpack.i.b16 %v432_v38, %v432_v38  ;;  %v895_v47 = vcombine.high %v2004_v27, %v2004_v27 }
  0x38   : > { %v653_v28 = vcombine.low %v640_v16, %v647_v17  ;;  %v660_v29 = vrot.slane %v652_v19, %v1903_v22  ;;  %v440_v30 = vpack.i.b16 %v439_v39, %v439_v39  ;;  %v902_v40 = vrot.slane %v2004_v27, %v1903_v22 }
  0x39   : > { %339 = vrot.lane.b32.xlu0 %v338_v25, %s1797_s14  ;;  %v438_v43 = vrot.slane %v433_v10, %v1945_v51  ;;  %v450_v24 = vcombine.low %v424_v23, %v431_v26  ;;  %v909_v41 = vrot.slane %v895_v47, %v1903_v22  ;;  %v918_v49 = vrot.slane %v2018_v45, %v1903_v22 }
  0x3a   : > { %v667_v31 = vrot.slane %v653_v28, %v1903_v22  ;;  %v445_v32 = vrot.slane %v440_v30, %v1945_v51  ;;  %v910_v51 = vcombine.high %v902_v40, %v902_v40  ;;  %vm742_vm0 = vcmask 277504  }
  0x3b   : > { %v458_v36 = vrot.slane %v450_v24, %v1903_v22  ;;  %v911_v44 = vcombine.high %v909_v41, %v909_v41  ;;  %vm614_vm1 = vcmask 261120   ;;  %vm412_vm2 = vcmask 15360  }
  0x3c   : > { %v668_v33 = vcombine.low %v660_v29, %v667_v31  ;;  %v451_v34 = vcombine.low %v438_v43, %v445_v32  ;;  %vm544_vm3 = vcmask 146432   ;;  %vm342_vm4 = vcmask 7168  }
  0x3d   : > { %vm672_vm5 = vcmask 269312   ;;  %v270_v10 = vcombine.low %v1987_v1, %v1970_v35  ;;  %v271_v28 = vcombine.low %v1973_v46, %v1976_v48  ;;  %vm470_vm6 = vcmask 130048  }
  0x3e   : > { %669 = vrot.lane.b32.xlu1 %v668_v33, %s1798_s16  ;;  %v465_v37 = vrot.slane %v451_v34, %v1903_v22  ;;  %vm1097_vm7 = vcmask 769024   ;;  %vm1102_vm8 = vcmask 1041408   ;;  %vm971_vm9 = vcmask 900096  }
  0x3f   : > { %v2079_v24 = vrot.slane %v270_v10, %v1903_v22  ;;  %v2082_v31 = vrot.slane %v271_v28, %v1903_v22  ;;  %vm929_vm10 = vcmask 908288   ;;  %vm1013_vm11 = vcmask 785408  }
  0x40   : > { %v466_v42 = vcombine.low %v458_v36, %v465_v37  ;;  %vm1056_vm12 = vcmask 777216   ;;  %vm845_vm13 = vcmask 1031168   ;;  %vm803_vm14 = vcmask 1039360  }
  0x41   : > { %v286_v46 = vcombine.low %v2079_v24, %v2082_v31  ;;  %vm1115_vm15 = vcmask 1043456  }
  0x42   : > { %467 = vrot.lane.b32.xlu0 %v466_v42, %s1799_s22  ;;  %923 = vrot.lane.b32.xlu1 %v909_v41, %s1800_s23 }
  0x46   : > { %921 = vrot.lane.b32.xlu0 %v910_v51, %s1800_s23  ;;  %925 = vrot.lane.b32.xlu1 %v911_v44, %s1800_s23 }
  0x4a   : > { %919 = vrot.lane.b32.xlu0 %v902_v40, %s1800_s23 }
  0x4e   : > { %927 = vrot.lane.b32.xlu0 %v918_v49, %s1800_s23 }
  0x96   : > { %v740_v50 = vpop.permute.xlu1 %739 }
  0x97   : > { %v741_v52 = vrot.slane %v740_v50, 6 }
  0x99   : > { %v743_v53 = vsel %vm742_vm0, %v741_v52, %v740_v50  ;;  %v747_v54 = vmul.bf16 %v741_v52, %v2018_v45  ;;  %v612_v55 = vpop.permute.xlu0 %611  ;;  %vm1124_vm0 = vcmask 1045504  }
  0x9a   : > { %v2024_v56 = vmul.bf16 %v743_v53, %v2004_v27  ;;  %v613_v57 = vrot.slane %v612_v55, 6 }
  0x9b   : > { %v1086_v58 = vrot.slane %v747_v54, %v1903_v22 }
  0x9c   : > { %v615_v59 = vsel %vm614_vm1, %v613_v57, %v612_v55  ;;  %v1070_v60 = vrot.slane %v2024_v56, %v1903_v22  ;;  %v619_v21 = vmul.bf16 %v613_v57, %v2018_v45  ;;  %v1063_v36 = vcombine.high %v2024_v56, %v2024_v56 }
  0x9d   : > { %v618_v61 = vmul.bf16 %v615_v59, %v2004_v27  ;;  %1095 = vrot.lane.b32.xlu0 %v1086_v58, %s1801_s28  ;;  %vm888_vm1 = vcmask 916480  }
  0x9e   : > { %v2031_v62 = vpop.permute.xlu1 %409  ;;  %1087 = vrot.lane.b32.xlu1 %v1070_v60, %s1801_s28  ;;  %v1078_v4 = vcombine.high %v1070_v60, %v1070_v60  ;;  %v1001_v26 = vrot.slane %v619_v21, %v1903_v22  ;;  %v1077_v42 = vrot.slane %v1063_v36, %v1903_v22  ;;  %v1171_v21 = vld [vmem:[%s2323_s2] sm:$0xff] }
  0x9f   : > { %v411_v63 = vrot.slane %v2031_v62, 6  ;;  %v985_v0 = vrot.slane %v618_v61, %v1903_v22  ;;  %v978_v20 = vcombine.high %v618_v61, %v618_v61 }
  0xa0   : > { %v1002_v32 = vcombine.low %v1001_v26, %v1001_v26 }
  0xa1   : > { %v413_v2 = vsel %vm412_vm2, %v411_v63, %v2031_v62  ;;  %1005 = vrot.lane.b32.xlu0 %v985_v0, %s1802_s24  ;;  %v993_v13 = vcombine.low %v985_v0, %v985_v0  ;;  %v2066_v19 = vrot.slane %v978_v20, %v1903_v22  ;;  %v417_v0 = vmul.bf16 %v411_v63, %v2018_v45 }
  0xa2   : > { %v2041_v3 = vmul.bf16 %v413_v2, %v2004_v27  ;;  %v1079_v20 = vcombine.high %v1077_v42, %v1077_v42  ;;  %vm1188_vm2 = vcmask 293888  }
  0xa4   : > { %v542_v5 = vpop.permute.xlu0 %541  ;;  %v2045_v12 = vrot.slane %v2041_v3, %v1903_v22  ;;  %v810_v44 = vcombine.high %v2041_v3, %v2041_v3 }
  0xa5   : > { %v543_v6 = vrot.slane %v542_v5, 6  ;;  %1089 = vrot.lane.b32.xlu0 %v1078_v4, %s1801_s28 }
  0xa6   : > { %837 = vrot.lane.b32.xlu1 %v2045_v12, %s1803_s25  ;;  %v825_v52 = vcombine.low %v2045_v12, %v2045_v12  ;;  %v824_v55 = vrot.slane %v810_v44, %v1903_v22 }
  0xa7   : > { %v545_v7 = vsel %vm544_vm3, %v543_v6, %v542_v5  ;;  %v549_v8 = vmul.bf16 %v543_v6, %v2018_v45  ;;  %v833_v5 = vrot.slane %v417_v0, %v1903_v22 }
  0xa8   : > { %v2052_v9 = vmul.bf16 %v545_v7, %v2004_v27  ;;  %v826_v58 = vcombine.low %v824_v55, %v824_v55 }
  0xa9   : > { %v953_v18 = vcombine.low %v549_v8, %v549_v8  ;;  %1003 = vrot.lane.b32.xlu0 %v993_v13, %s1802_s24  ;;  %v834_v63 = vcombine.low %v833_v5, %v833_v5 }
  0xaa   : > { %v2057_v11 = vrot.slane %v2052_v9, %v1903_v22  ;;  %v936_v56 = vcombine.low %v2052_v9, %v2052_v9  ;;  %v994_v9 = vcombine.low %v2066_v19, %v2066_v19 }
  0xab   : > { %v340_v14 = vpop.permute.xlu0 %339  ;;  %v960_v15 = vrot.slane %v953_v18, %v1903_v22 }
  0xac   : > { %v341_v16 = vrot.slane %v340_v14, 6  ;;  %965 = vrot.lane.b32.xlu1 %v2057_v11, %s1804_s26  ;;  %v943_v61 = vrot.slane %v936_v56, %v1903_v22  ;;  %v952_v6 = vcombine.high %v2057_v11, %v2057_v11 }
  0xad   : > { %969 = vrot.lane.b32.xlu0 %v960_v15, %s1804_s26 }
  0xae   : > { %v343_v38 = vsel %vm342_vm4, %v341_v16, %v340_v14  ;;  %v347_v41 = vmul.bf16 %v341_v16, %v2018_v45  ;;  %v951_v4 = vcombine.high %v943_v61, %v943_v61  ;;  %v1172_v16 = vld [vmem:[%s2323_s2 + $0x8] sm:$0xff] }
  0xaf   : > { %v346_v17 = vmul.bf16 %v343_v38, %v2004_v27 }
  0xb0   : > { %v670_v23 = vpop.permute.xlu1 %669  ;;  %v785_v50 = vcombine.low %v347_v41, %v347_v41 }
  0xb1   : > { %v671_v39 = vrot.slane %v670_v23, 6  ;;  %v782_v25 = vrot.slane %v346_v17, %v1903_v22  ;;  %1009 = vrot.lane.b32.xlu0 %v2066_v19, %s1802_s24  ;;  %v768_v1 = vcombine.low %v346_v17, %v346_v17 }
  0xb2   : > { %v792_v57 = vrot.slane %v785_v50, %v1903_v22 }
  0xb3   : > { %v673_v29 = vsel %vm672_vm5, %v671_v39, %v670_v23  ;;  %797 = vrot.lane.b32.xlu1 %v782_v25, %s1805_s27  ;;  %v775_v40 = vrot.slane %v768_v1, %v1903_v22  ;;  %v677_v49 = vmul.bf16 %v671_v39, %v2018_v45  ;;  %v784_v54 = vcombine.high %v782_v25, %v782_v25 }
  0xb4   : > { %v676_v30 = vmul.bf16 %v673_v29, %v2004_v27  ;;  %v468_v43 = vpop.permute.xlu0 %467  ;;  %v924_v19 = vpop.permute.xlu1 %923 }
  0xb5   : > { %v469_v47 = vrot.slane %v468_v43, 6  ;;  %v1037_v53 = vcombine.low %v677_v49, %v677_v49  ;;  %v783_v13 = vcombine.high %v775_v40, %v775_v40 }
  0xb6   : > { %v1034_v35 = vrot.slane %v676_v30, %v1903_v22  ;;  %v1020_v60 = vcombine.low %v676_v30, %v676_v30 }
  0xb7   : > { %1011 = vrot.lane.b32.xlu1 %v1002_v32, %s1802_s24  ;;  %v471_v48 = vsel %vm470_vm6, %v469_v47, %v468_v43  ;;  %v1044_v59 = vrot.slane %v1037_v53, %v1903_v22  ;;  %v475_v62 = vmul.bf16 %v469_v47, %v2018_v45  ;;  %v1808_v45 = vmov 0  }
  0xb8   : > { %v474_v33 = vmul.bf16 %v471_v48, %v2004_v27  ;;  %v1036_v34 = vcombine.low %v1034_v35, %v1034_v35  ;;  %v1027_v3 = vrot.slane %v1020_v60, %v1903_v22  ;;  %1236 = vmatprep.mubr.bf16.mxu0 %v1808_v45  ;;  %1279 = vmatprep.mubr.bf16.mxu1 %v1808_v45  ;;  %v2148_v38 = vpop.permute.xlu0 %921  ;;  %v926_v39 = vpop.permute.xlu1 %925 }
  0xb9   : > { %v1045_v2 = vcombine.low %v1044_v59, %v1044_v59  ;;  %v869_v8 = vcombine.low %v475_v62, %v475_v62  ;;  %1728 = vset.pattern.permute.xlu1 %v1808_v45  ;;  %1729 = vset.pattern.permute.xlu0 %v1808_v45 }
  0xba   : > { %v852_v37 = vcombine.low %v474_v33, %v474_v33  ;;  %1050 = vrot.lane.b32.xlu0 %v1036_v34, %s1806_s29  ;;  %v866_v12 = vrot.slane %v474_v33, %v1903_v22  ;;  %v1035_v15 = vcombine.low %v1027_v3, %v1027_v3 }
  0xbb   : > { %1052 = vrot.lane.b32.xlu1 %v1034_v35, %s1806_s29  ;;  %v876_v11 = vrot.slane %v869_v8, %v1903_v22 }
  0xbc   : > { %v859_v51 = vrot.slane %v852_v37, %v1903_v22  ;;  %v868_v7 = vcombine.low %v866_v12, %v866_v12  ;;  %v2150_v17 = vpop.permute.xlu0 %919 }
  0xbd   : > { %v877_v14 = vcombine.low %v876_v11, %v876_v11 }
  0xbe   : > { %793 = vrot.lane.b32.xlu0 %v775_v40, %s1805_s27  ;;  %v867_v18 = vcombine.low %v859_v51, %v859_v51 }
  0xbf   : > { %1091 = vrot.lane.b32.xlu1 %v1077_v42, %s1801_s28 }
  0xc0   : > { %v928_v23 = vpop.permute.xlu0 %927 }
  0xc1   : > { %v933_v31 = vsel %vm929_vm10, %v926_v39, %v928_v23 }
  0xc2   : > { %880 = vrot.lane.b32.xlu0 %v859_v51, %s1807_s30 }
  0xc3   : > { %835 = vrot.lane.b32.xlu1 %v825_v52, %s1803_s25 }
  0xc6   : > { %799 = vrot.lane.b32.xlu0 %v784_v54, %s1805_s27 }
  0xc7   : > { %801 = vrot.lane.b32.xlu1 %v792_v57, %s1805_s27  ;;  %v288_v57 = vmul.bf16 %v286_v46, %v2004_v27  ;;  %v932_v27 = vsel %vm929_vm10, %v924_v19, %v926_v39 }
  0xc9   : > { %v756_v60 = vrot.slane %v288_v57, %v1903_v22  ;;  %v749_v11 = vcombine.high %v288_v57, %v288_v57 }
  0xca   : > { %839 = vrot.lane.b32.xlu0 %v826_v58, %s1803_s25 }
  0xcb   : > { %961 = vrot.lane.b32.xlu1 %v943_v61, %s1804_s26 }
  0xce   : > { %1054 = vrot.lane.b32.xlu0 %v1045_v2, %s1806_s29  ;;  %v931_v2 = vsel %vm929_vm10, %v2148_v38, %v924_v19 }
  0xcf   : > { %1048 = vrot.lane.b32.xlu1 %v1027_v3, %s1806_s29 }
  0xd2   : > { %963 = vrot.lane.b32.xlu0 %v951_v4, %s1804_s26 }
  0xd3   : > { %967 = vrot.lane.b32.xlu1 %v952_v6, %s1804_s26 }
  0xd6   : > { %843 = vrot.lane.b32.xlu0 %v834_v63, %s1803_s25 }
  0xd7   : > { %882 = vrot.lane.b32.xlu1 %v868_v7, %s1807_s30 }
  0xda   : > { %795 = vrot.lane.b32.xlu0 %v783_v13, %s1805_s27 }
  0xdb   : > { %1007 = vrot.lane.b32.xlu1 %v994_v9, %s1802_s24 }
  0xde   : > { %878 = vrot.lane.b32.xlu0 %v867_v18, %s1807_s30  ;;  %v930_v18 = vsel %vm929_vm10, %v2150_v17, %v2148_v38 }
  0xdf   : > { %1093 = vrot.lane.b32.xlu1 %v1079_v20, %s1801_s28 }
  0xe2   : > { %886 = vrot.lane.b32.xlu0 %v877_v14, %s1807_s30 }
  0xe3   : > { %1046 = vrot.lane.b32.xlu1 %v1035_v15, %s1806_s29 }
  0xe6   : > { %1180 = vperm.xlu0 %1729, %v1172_v16  }
  0xe7   : > { %841 = vrot.lane.b32.xlu1 %v824_v55, %s1803_s25 }
  0xeb   : > { %884 = vrot.lane.b32.xlu1 %v866_v12, %s1807_s30  ;;  %v764_v12 = vcombine.high %v756_v60, %v756_v60 }
  0xef   : > { %1175 = vperm.xlu1 %1728, %v1171_v21  }
 0x10f   : > { %v2152_v25 = vpop.permute.xlu0 %1095 }
 0x110   : > { %v1088_v26 = vpop.permute.xlu1 %1087 }
 0x113   : > { %v2154_v10 = vpop.permute.xlu0 %1005 }
 0x117   : > { %v1090_v28 = vpop.permute.xlu0 %1089 }
 0x118   : > { %v2156_v29 = vpop.permute.xlu1 %837  ;;  %v1098_v34 = vsel %vm1097_vm7, %v1088_v26, %v1090_v28 }
 0x119   : > { %v1193_v41 = vsel %vm1102_vm8, %v1098_v34, 0 }
 0x11b   : > { %v2158_v30 = vpop.permute.xlu0 %1003 }
 0x11e   : > { %v966_v43 = vpop.permute.xlu1 %965 }
 0x11f   : > { %v970_v32 = vpop.permute.xlu0 %969 }
 0x123   : > { %v1010_v35 = vpop.permute.xlu0 %1009 }
 0x125   : > { %v2160_v47 = vpop.permute.xlu1 %797 }
 0x129   : > { %v1012_v48 = vpop.permute.xlu1 %1011 }
 0x12a   : > { %v1017_v7 = vsel %vm1013_vm11, %v1010_v35, %v1012_v48 }
 0x12c   : > { %v2162_v1 = vpop.permute.xlu0 %1050 }
 0x12d   : > { %v2164_v33 = vpop.permute.xlu1 %1052 }
 0x130   : > { %v2167_v36 = vpop.permute.xlu0 %793 }
 0x131   : > { %v1092_v37 = vpop.permute.xlu1 %1091 }
 0x132   : > { %v1099_v40 = vsel %vm1097_vm7, %v1090_v28, %v1092_v37 }
 0x133   : > { %1621 = vmatprep.subr.msk.bf16.mxu0 %vm1102_vm8, %v1099_v40 }
 0x134   : > { %1215 = vmatpush1.bf16.msra.mxu0 %v1193_v41  ;;  %v2172_v42 = vpop.permute.xlu0 %880 }
 0x135   : > { %v2174_v51 = vpop.permute.xlu1 %835 }
 0x138   : > { %v2176_v44 = vpop.permute.xlu0 %799 }
 0x139   : > { %v2178_v49 = vpop.permute.xlu1 %801 }
 0x13c   : > { %v2180_v50 = vpop.permute.xlu0 %839 }
 0x13d   : > { %v962_v52 = vpop.permute.xlu1 %961  ;;  %v847_v39 = vsel %vm845_vm13, %v2156_v29, %v2180_v50 }
 0x140   : > { %v1055_v53 = vpop.permute.xlu0 %1054 }
 0x141   : > { %v1049_v54 = vpop.permute.xlu1 %1048  ;;  %v1060_v19 = vsel %vm1056_vm12, %v2164_v33, %v1055_v53 }
 0x142   : > { %v1058_v6 = vsel %vm1056_vm12, %v1049_v54, %v2162_v1 }
 0x144   : > { %v964_v55 = vpop.permute.xlu0 %963 }
 0x145   : > { %v968_v56 = vpop.permute.xlu1 %967  ;;  %v973_v0 = vsel %vm971_vm9, %v964_v55, %v966_v43  ;;  %v972_v13 = vsel %vm971_vm9, %v962_v52, %v964_v55  ;;  %v806_v55 = vsel %vm803_vm14, %v2160_v47, %v2176_v44 }
 0x146   : > { %v975_v61 = vsel %vm971_vm9, %v968_v56, %v970_v32  ;;  %v1142_v4 = vsel %vm1102_vm8, %v931_v2, %v973_v0  ;;  %v974_v8 = vsel %vm971_vm9, %v966_v43, %v968_v56  ;;  %v1139_v17 = vsel %vm1102_vm8, %v930_v18, %v972_v13 }
 0x147   : > { %v1148_v3 = vsel %vm1102_vm8, %v933_v31, %v975_v61  ;;  %v1145_v38 = vsel %vm1102_vm8, %v932_v27, %v974_v8  ;;  %v1014_v43 = vsel %vm1013_vm11, %v2158_v30, %v2154_v10  ;;  %v763_v32 = vrot.slane %v749_v11, %v1903_v22 }
 0x148   : > { %v2186_v58 = vpop.permute.xlu0 %843  ;;  %v1156_v14 = vsel %vm1115_vm15, %v1148_v3, %v1017_v7  ;;  %v1150_v40 = vsel %vm1115_vm15, %v1139_v17, %v1014_v43  ;;  %v807_v56 = vsel %vm803_vm14, %v2176_v44, %v2178_v49 }
 0x149   : > { %v2188_v59 = vpop.permute.xlu1 %882  ;;  %v1167_v26 = vsel %vm1124_vm0, %v1156_v14, %v1060_v19  ;;  %v765_v53 = vcombine.high %v763_v32, %v763_v32 }
 0x14a   : > { %v890_v41 = vsel %vm888_vm1, %v2172_v42, %v2188_v59 }
 0x14b   : > { %v1114_v44 = vsel %vm1102_vm8, %v765_v53, %v807_v56 }
 0x14c   : > { %v796_v24 = vpop.permute.xlu0 %795 }
 0x14d   : > { %v1008_v46 = vpop.permute.xlu1 %1007  ;;  %v805_v62 = vsel %vm803_vm14, %v796_v24, %v2160_v47  ;;  %v1111_v47 = vsel %vm1102_vm8, %v763_v32, %v806_v55 }
 0x14e   : > { %v1015_v5 = vsel %vm1013_vm11, %v2154_v10, %v1008_v46  ;;  %v1016_v20 = vsel %vm1013_vm11, %v1008_v46, %v1010_v35  ;;  %v1108_v15 = vsel %vm1102_vm8, %v764_v12, %v805_v62 }
 0x14f   : > { %v1152_v63 = vsel %vm1115_vm15, %v1142_v4, %v1015_v5  ;;  %v1154_v28 = vsel %vm1115_vm15, %v1145_v38, %v1016_v20  ;;  %v1119_v34 = vsel %vm1115_vm15, %v1108_v15, %v847_v39 }
 0x150   : > { %v1161_v9 = vsel %vm1124_vm0, %v1152_v63, %v1058_v6  ;;  %v879_v35 = vpop.permute.xlu0 %878  ;;  %v1809_v6 = vmov 0.0  }
 0x151   : > { %v1094_v45 = vpop.permute.xlu1 %1093  ;;  %1216 = vmatprep.subr.bf16.mxu0 %v1161_v9  ;;  %v889_v52 = vsel %vm888_vm1, %v879_v35, %v2172_v42 }
 0x152   : > { %v1101_v16 = vsel %vm1097_vm7, %v1094_v45, %v2152_v25  ;;  %v1100_v21 = vsel %vm1097_vm7, %v1092_v37, %v1094_v45  ;;  %v804_v25 = vsel %vm803_vm14, %v2167_v36, %v796_v24  ;;  %v1059_v36 = vsel %vm1056_vm12, %v2162_v1, %v2164_v33 }
 0x153   : > { %1623 = vmatprep.subr.msk.bf16.mxu1 %vm1102_vm8, %v1101_v16  ;;  %v1199_v23 = vsel %vm1102_vm8, %v1100_v21, 0  ;;  %v1105_v10 = vsel %vm1102_vm8, %v756_v60, %v804_v25  ;;  %v1164_v30 = vsel %vm1124_vm0, %v1154_v28, %v1059_v36  ;;  %v1129_v1 = vsel %vm1124_vm0, %v1119_v34, %v890_v41 }
 0x154   : > { %1258 = vmatpush1.bf16.msra.mxu1 %v1199_v23  ;;  %v846_v33 = vsel %vm845_vm13, %v2174_v51, %v2156_v29  ;;  %v1751_v51 = vld [vmem:[%s2322_s1] sm:$0xff]   ;;  %v887_v49 = vpop.permute.xlu0 %886 }
 0x155   : > { %v1047_v48 = vpop.permute.xlu1 %1046  ;;  %1259 = vmatprep.subr.bf16.mxu1 %v1167_v26  ;;  %v1117_v42 = vsel %vm1115_vm15, %v1105_v10, %v846_v33 }
 0x156   : > { %v1057_v37 = vsel %vm1056_vm12, %v1047_v48, %v1049_v54  ;;  %v1126_v29 = vsel %vm1124_vm0, %v1117_v42, %v889_v52 }
 0x157   : > { %v1158_v22 = vsel %vm1124_vm0, %v1150_v40, %v1057_v37 }
 0x158   : > { %1217 = vmatpush1.bf16.msra.mxu0 %v1158_v22  ;;  %1260 = vmatpush1.bf16.msra.mxu1 %v1164_v30 }
 0x159   : > { %v842_v54 = vpop.permute.xlu1 %841  ;;  %1218 = vmatprep.subr.bf16.mxu0 %v1129_v1 }
 0x15a   : > { %v848_v57 = vsel %vm845_vm13, %v2180_v50, %v842_v54  ;;  %v849_v60 = vsel %vm845_vm13, %v842_v54, %v2186_v58 }
 0x15b   : > { %v1123_v58 = vsel %vm1115_vm15, %v1114_v44, %v849_v60  ;;  %v1121_v2 = vsel %vm1115_vm15, %v1111_v47, %v848_v57 }
 0x15c   : > { %1219 = vmatpush1.bf16.msra.mxu0 %v1126_v29 }
 0x15d   : > { %v885_v61 = vpop.permute.xlu1 %884 }
 0x15e   : > { %v891_v50 = vsel %vm888_vm1, %v2188_v59, %v885_v61  ;;  %v892_v0 = vsel %vm888_vm1, %v885_v61, %v887_v49 }
 0x15f   : > { %1622 = vmatmul.mubr.msk.bf16.vlgmr.msra.gmra.mxu0 %vm1188_vm2, %v1751_v51  ;;  %v1135_v24 = vsel %vm1124_vm0, %v1123_v58, %v892_v0  ;;  %v1132_v27 = vsel %vm1124_vm0, %v1121_v2, %v891_v50 }
 0x160   : > { %1261 = vmatprep.subr.bf16.mxu1 %v1135_v24 }
 0x161   : > { %1262 = vmatpush1.bf16.msra.mxu1 %v1132_v27  ;;  %v1181_v5 = vpop.permute.xlu0 %1180 }
 0x164   : > { %1624 = vmatmul.mubr.msk.bf16.vlgmr.msra.gmra.mxu1 %vm1188_vm2, %v1751_v51 }
 0x16a   : > { %v1176_v31 = vpop.permute.xlu1 %1175 }
 0x21f   : > { %v1238_v46 = vpop.f32.mrf.mxu0 }
 0x220   : > { %v1239_v3 = vadd.f32 %v1238_v46, %v1176_v31 }
 0x221   : > { %v1240_v4 = vpop.f32.mrf.mxu0 }
 0x222   : > { %1290 = vst [vmem:[#allocation2 + $0x30] sm:$0xff] %v1239_v3  ;;  %vm1306_vm3 = vcmp.ge.f32.partialorder %v1239_v3, 0.999  ;;  %v1631_v59 = vadd.f32 -0.999, %v1239_v3  ;;  %v1241_v12 = vadd.f32 %v1240_v4, %v1176_v31 }
 0x223   : > { %v1625_v62 = vsel %vm1306_vm3, 1.0, %v1809_v6  ;;  %v1242_v63 = vpop.f32.mrf.mxu0 }
 0x224   : > { %1291 = vst [vmem:[#allocation2] sm:$0xff] %v1241_v12  ;;  %vm1307_vm4 = vcmp.ge.f32.partialorder %v1241_v12, 0.999  ;;  %v1632_v7 = vadd.f32 -0.999, %v1241_v12  ;;  %v1243_v8 = vadd.f32 %v1242_v63, %v1181_v5  ;;  %v1281_v13 = vpop.f32.mrf.mxu1  ;;  %v1336_v11 = vsel %vm1306_vm3, %v1631_v59, %v1239_v3 }
 0x225   : > { %v1626_v9 = vsel %vm1307_vm4, 1.0, %v1809_v6  ;;  %v1282_v18 = vadd.f32 %v1281_v13, %v1176_v31  ;;  %v1244_v20 = vpop.f32.mrf.mxu0 }
 0x226   : > { %v1660_v45 = vpack.c.bf16 %v1626_v9, %v1625_v62  ;;  %1294 = vst [vmem:[#allocation2 + $0x8] sm:$0xff] %v1243_v8  ;;  %vm1308_vm5 = vcmp.ge.f32.partialorder %v1243_v8, 0.999  ;;  %v1633_v14 = vadd.f32 -0.999, %v1243_v8  ;;  %v1245_v15 = vadd.f32 %v1244_v20, %v1181_v5  ;;  %v1283_v16 = vpop.f32.mrf.mxu1 }
 0x227   : > { %1292 = vst [vmem:[#allocation2 + $0x18] sm:$0xff] %v1282_v18  ;;  %v1344_v21 = vadd.f32 %v1336_v11, %v1282_v18  ;;  %v1284_v19 = vadd.f32 %v1283_v16, %v1176_v31  ;;  %v1627_v38 = vsel %vm1308_vm5, 1.0, %v1809_v6  ;;  %v1337_v23 = vsel %vm1307_vm4, %v1632_v7, %v1241_v12 }
 0x228   : > { %1330 = vst [vmem:[%s1878_s7] sm:$0xff] %v1660_v45  ;;  %1295 = vst [vmem:[#allocation2 + $0x20] sm:$0xff] %v1245_v15  ;;  %vm1309_vm6 = vcmp.ge.f32.partialorder %v1245_v15, 0.999  ;;  %v1634_v17 = vadd.f32 -0.999, %v1245_v15  ;;  %v1285_v39 = vpop.f32.mrf.mxu1  ;;  %v1338_v32 = vsel %vm1308_vm5, %v1633_v14, %v1243_v8 }
 0x229   : > { %vm1348_vm7 = vcmp.ge.f32.partialorder %v1344_v21, 0.999  ;;  %v1628_v25 = vsel %vm1309_vm6, 1.0, %v1809_v6  ;;  %1293 = vst [vmem:[#allocation2 + $0x10] sm:$0xff] %v1284_v19  ;;  %v1345_v26 = vadd.f32 %v1337_v23, %v1284_v19  ;;  %v1286_v28 = vadd.f32 %v1285_v39, %v1181_v5 }
 0x22a   : > { %v1661_v43 = vpack.c.bf16 %v1628_v25, %v1627_v38  ;;  %v1287_v35 = vpop.f32.mrf.mxu1  ;;  %v1635_v36 = vsel %vm1348_vm7, 1.0, %v1809_v6  ;;  %v1339_v40 = vsel %vm1309_vm6, %v1634_v17, %v1245_v15 }
 0x22b   : > { %vm1349_vm8 = vcmp.ge.f32.partialorder %v1345_v26, 0.999  ;;  %1296 = vst [vmem:[#allocation2 + $0x28] sm:$0xff] %v1286_v28  ;;  %v1346_v48 = vadd.f32 %v1338_v32, %v1286_v28  ;;  %v1288_v34 = vadd.f32 %v1287_v35, %v1181_v5 }
 0x22c   : > { %1331 = vst [vmem:[%s1878_s7 + $0x10] sm:$0xff] %v1661_v43  ;;  %v1636_v37 = vsel %vm1349_vm8, 1.0, %v1809_v6 }
 0x22d   : > { %v1662_v41 = vpack.c.bf16 %v1636_v37, %v1635_v36  ;;  %vm1350_vm9 = vcmp.ge.f32.partialorder %v1346_v48, 0.999  ;;  %1297 = vst [vmem:[#allocation2 + $0x38] sm:$0xff] %v1288_v34  ;;  %v1347_v10 = vadd.f32 %v1339_v40, %v1288_v34 }
 0x22e   : > { %v1637_v22 = vsel %vm1350_vm9, 1.0, %v1809_v6 }
 0x22f   : > { %1372 = vst [vmem:[%s1878_s7 + $0x8] sm:$0xff] %v1662_v41  ;;  %vm1351_vm10 = vcmp.ge.f32.partialorder %v1347_v10, 0.999 }
 0x230   : > { %v1638_v30 = vsel %vm1351_vm10, 1.0, %v1809_v6 }
 0x231   : > { %v1663_v52 = vpack.c.bf16 %v1638_v30, %v1637_v22 }
 0x233   : > { %1373 = vst [vmem:[%s1878_s7 + $0x18] sm:$0xff] %v1663_v52 }
 0x234 PF: > { %p1641_p8 = scmp.eq.s32.totalorder %s1774_s15, 0 }
 0x235   : > { %s1378_s12 = scvt.s32.f32 (!%p1641_p8), %s1774_s15 }
 0x236   : > { %1377 = sbr.rel (%p1641_p8) target bundleno = 598 (0x256), region = 44 }
 0x23b   : > { %v1379_v1 = vld [vmem:[#allocation2 + $0x30] sm:$0xff]  ;;  %v1380_v33 = vld [vmem:[#allocation2] sm:$0xff]  ;;  %v1381_v53 = vld [vmem:[#allocation2 + $0x8] sm:$0xff]  ;;  %v1383_v42 = vstv %s1378_s12  ;;  %v1810_v36 = vmov 0.0  }
 0x23c   : > { %v1382_v54 = vld [vmem:[#allocation2 + $0x20] sm:$0xff]  ;;  %v1446_v55 = vld [vmem:[#allocation2 + $0x18] sm:$0xff]  ;;  %v1447_v56 = vld [vmem:[#allocation2 + $0x10] sm:$0xff]  ;;  %v1384_v29 = vmul.f32 %v1383_v42, %v1379_v1  ;;  %v1385_v51 = vmul.f32 %v1383_v42, %v1380_v33  ;;  %v1386_v47 = vmul.f32 %v1383_v42, %v1381_v53 }
 0x23d   : > { %v1448_v57 = vld [vmem:[#allocation2 + $0x28] sm:$0xff]  ;;  %v2290_v60 = vld [vmem:[#allocation2 + $0x38] sm:$0xff]  ;;  %v1387_v44 = vmul.f32 %v1383_v42, %v1382_v54  ;;  %v1450_v49 = vmul.f32 %v1446_v55, %v1383_v42  ;;  %v1451_v61 = vmul.f32 %v1447_v56, %v1383_v42 }
 0x23e   : > { %v1452_v50 = vmul.f32 %v1448_v57, %v1383_v42  ;;  %v1453_v0 = vmul.f32 %v2290_v60, %v1383_v42  ;;  %v1388_v58 = vmul.f32 1.001001, %v1384_v29  ;;  %v1389_v2 = vmul.f32 1.001001, %v1385_v51 }
 0x23f   : > { %v1390_v24 = vmul.f32 1.001001, %v1386_v47  ;;  %v1391_v27 = vmul.f32 1.001001, %v1387_v44  ;;  %v1454_v31 = vmul.f32 1.001001, %v1450_v49 }
 0x240   : > { %v1455_v46 = vmul.f32 1.001001, %v1451_v61  ;;  %v1392_v3 = vfloor.f32 %v1388_v58  ;;  %v1393_v4 = vfloor.f32 %v1389_v2  ;;  %v1456_v59 = vmul.f32 1.001001, %v1452_v50 }
 0x241   : > { %v1394_v5 = vfloor.f32 %v1390_v24  ;;  %v1395_v12 = vfloor.f32 %v1391_v27  ;;  %v1458_v6 = vfloor.f32 %v1454_v31  ;;  %v1457_v63 = vmul.f32 1.001001, %v1453_v0 }
 0x242   : > { %v1459_v62 = vfloor.f32 %v1455_v46  ;;  %v1396_v7 = vmul.f32 0.999, %v1392_v3  ;;  %v1397_v8 = vmul.f32 0.999, %v1393_v4  ;;  %v1460_v9 = vfloor.f32 %v1456_v59 }
 0x243   : > { %v1398_v13 = vmul.f32 0.999, %v1394_v5  ;;  %v1399_v18 = vmul.f32 0.999, %v1395_v12  ;;  %v1462_v11 = vmul.f32 0.999, %v1458_v6  ;;  %v1461_v45 = vfloor.f32 %v1457_v63 }
 0x244   : > { %v1463_v20 = vmul.f32 0.999, %v1459_v62  ;;  %v1400_v14 = vsub.f32 %v1384_v29, %v1396_v7  ;;  %v1401_v15 = vsub.f32 %v1385_v51, %v1397_v8  ;;  %v1464_v21 = vmul.f32 0.999, %v1460_v9 }
 0x245   : > { %v1402_v16 = vsub.f32 %v1386_v47, %v1398_v13  ;;  %v1403_v19 = vsub.f32 %v1387_v44, %v1399_v18  ;;  %v1466_v38 = vsub.f32 %v1450_v49, %v1462_v11  ;;  %v1465_v23 = vmul.f32 0.999, %v1461_v45 }
 0x246   : > { %v1467_v17 = vsub.f32 %v1451_v61, %v1463_v20  ;;  %v1404_v39 = vadd.f32 %v1400_v14, %v1379_v1  ;;  %v1405_v25 = vadd.f32 %v1401_v15, %v1380_v33  ;;  %v1468_v28 = vsub.f32 %v1452_v50, %v1464_v21 }
 0x247   : > { %v1406_v26 = vadd.f32 %v1402_v16, %v1381_v53  ;;  %v1407_v43 = vadd.f32 %v1403_v19, %v1382_v54  ;;  %v1470_v32 = vadd.f32 %v1466_v38, %v1446_v55  ;;  %v1469_v48 = vsub.f32 %v1453_v0, %v1465_v23 }
 0x248   : > { %v1471_v35 = vadd.f32 %v1467_v17, %v1447_v56  ;;  %vm1412_vm11 = vcmp.ge.f32.partialorder %v1404_v39, 0.999  ;;  %vm1413_vm12 = vcmp.ge.f32.partialorder %v1405_v25, 0.999  ;;  %v1472_v34 = vadd.f32 %v1468_v28, %v1448_v57 }
 0x249   : > { %vm1414_vm13 = vcmp.ge.f32.partialorder %v1406_v26, 0.999  ;;  %v1642_v37 = vsel %vm1412_vm11, 1.0, %v1810_v36  ;;  %v1643_v40 = vsel %vm1413_vm12, 1.0, %v1810_v36  ;;  %vm1415_vm14 = vcmp.ge.f32.partialorder %v1407_v43, 0.999 }
 0x24a   : > { %v1644_v41 = vsel %vm1414_vm13, 1.0, %v1810_v36  ;;  %v1664_v10 = vpack.c.bf16 %v1643_v40, %v1642_v37  ;;  %v1645_v22 = vsel %vm1415_vm14, 1.0, %v1810_v36  ;;  %v1648_v30 = vadd.f32 -0.999, %v1404_v39 }
 0x24b   : > { %v1649_v52 = vadd.f32 -0.999, %v1405_v25  ;;  %v1665_v1 = vpack.c.bf16 %v1645_v22, %v1644_v41  ;;  %v1650_v33 = vadd.f32 -0.999, %v1406_v26  ;;  %v1651_v53 = vadd.f32 -0.999, %v1407_v43 }
 0x24c   : > { %v1473_v54 = vadd.f32 %v1469_v48, %v2290_v60  ;;  %1436 = vst [vmem:[%s1878_s7] sm:$0xff] %v1664_v10  ;;  %v1442_v55 = vsel %vm1412_vm11, %v1648_v30, %v1404_v39 }
 0x24d   : > { %v1443_v56 = vsel %vm1413_vm12, %v1649_v52, %v1405_v25  ;;  %1437 = vst [vmem:[%s1878_s7 + $0x10] sm:$0xff] %v1665_v1  ;;  %v1474_v42 = vadd.f32 %v1470_v32, %v1442_v55  ;;  %v1444_v29 = vsel %vm1414_vm13, %v1650_v33, %v1406_v26  ;;  %v1445_v51 = vsel %vm1415_vm14, %v1651_v53, %v1407_v43 }
 0x24e   : > { %v1475_v57 = vadd.f32 %v1471_v35, %v1443_v56  ;;  %v1476_v47 = vadd.f32 %v1472_v34, %v1444_v29  ;;  %v1477_v44 = vadd.f32 %v1473_v54, %v1445_v51 }
 0x24f   : > { %vm1478_vm15 = vcmp.ge.f32.partialorder %v1474_v42, 0.999 }
 0x250   : > { %vm1479_vm0 = vcmp.ge.f32.partialorder %v1475_v57, 0.999  ;;  %v1652_v49 = vsel %vm1478_vm15, 1.0, %v1810_v36  ;;  %vm1480_vm1 = vcmp.ge.f32.partialorder %v1476_v47, 0.999 }
 0x251   : > { %v1653_v60 = vsel %vm1479_vm0, 1.0, %v1810_v36  ;;  %vm1481_vm2 = vcmp.ge.f32.partialorder %v1477_v44, 0.999  ;;  %v1654_v50 = vsel %vm1480_vm1, 1.0, %v1810_v36 }
 0x252   : > { %v1666_v61 = vpack.c.bf16 %v1653_v60, %v1652_v49  ;;  %v1655_v0 = vsel %vm1481_vm2, 1.0, %v1810_v36 }
 0x253   : > { %v1667_v58 = vpack.c.bf16 %v1655_v0, %v1654_v50 }
 0x254   : > { %1502 = vst [vmem:[%s1878_s7 + $0x8] sm:$0xff] %v1666_v61 }
 0x255   : > { %1503 = vst [vmem:[%s1878_s7 + $0x18] sm:$0xff] %v1667_v58 }
 0x256 PF: > { %s14_s19 = sadd.s32 1, %s1790_s19   ;;  %s2326_s15 = smov %s1782_s17 }
 0x257   : > { %p11_p9 = scmp.ge.s32.totalorder %s14_s19, 6   ;;  %s2327_s16 = smov %s1786_s18 }
 0x258   : > { %s2328_s17 = smov %s2331_s20  ;;  %s2329_s18 = smov %s2335_s21 }
 0x259   :  { %13 = sbr.rel (!%p11_p9) target bundleno = 3 (0x3), region = 74 }

</bundles_post_ra>
